<compile_context>
chip_gen: v5e
topology: v5e:2x2
jax: 0.10.0
libtpu: 0.0.40
codegen_flags: <defaults>
</compile_context>

<pallas_src>
import functools

import jax
import jax.numpy as jnp
from jax.experimental import pallas as pl
from jax.experimental.pallas import tpu as pltpu

MOMENTUM = 0.1


# ---------------------------------------------------------------------------
# Kernels. Block layout: x (NC, TW), mean / running-mean tiles (1, TW) f32.
# rm arrives either as a (1, TW) f32 VMEM tile (updated buffer) or as a
# (1, 1) f32 scalar in SMEM (the initial zeros(1,1,1,1) buffer).
# Every grid step owns a disjoint lane range -> grid axis is "parallel".
# ---------------------------------------------------------------------------

def _vn_train_kernel_full(rm_ref, x_ref, out_ref, new_rm_ref, *, momentum):
    x = x_ref[...]
    mean32 = jnp.mean(x.astype(jnp.float32), axis=0, keepdims=True)   # (1, TW)
    out_ref[...] = (x - mean32.astype(x.dtype)).astype(out_ref.dtype)
    new_rm_ref[...] = ((1.0 - momentum) * rm_ref[...].astype(jnp.float32)
                       + momentum * mean32)


def _vn_train_kernel_scalar(rm_smem, x_ref, out_ref, new_rm_ref, *, momentum):
    x = x_ref[...]
    mean32 = jnp.mean(x.astype(jnp.float32), axis=0, keepdims=True)   # (1, TW)
    out_ref[...] = (x - mean32.astype(x.dtype)).astype(out_ref.dtype)
    rm0 = rm_smem[0, 0]                                               # f32 scalar
    new_rm_ref[...] = (1.0 - momentum) * rm0 + momentum * mean32


def _vn_eval_kernel_full(rm_ref, x_ref, out_ref):
    x = x_ref[...]
    out_ref[...] = (x - rm_ref[...].astype(x.dtype)).astype(out_ref.dtype)


def _vn_eval_kernel_scalar(rm_smem, x_ref, out_ref):
    x = x_ref[...]
    out_ref[...] = (x - rm_smem[0, 0].astype(x.dtype)).astype(out_ref.dtype)


# ---------------------------------------------------------------------------
# Tile sizing: lane axis (H*W) in multiples of 128, ~4 MiB per x block, bias
# toward >=4 grid steps so "parallel" can shard across 2 TCs on v7x.
# ---------------------------------------------------------------------------

def _pick_tw(hw, row_bytes, target_bytes=4 << 20):
    if hw % 128 != 0:
        # Single full-extent block along lanes (always layout-legal).
        # TODO(synk): for huge non-128-multiple spatial extents this could be
        # split along the NC (sublane) axis instead; not needed for pyramid
        # image shapes (powers of two).
        return hw
    target_tw = max(128, (target_bytes // max(row_bytes, 1)) // 128 * 128)
    if hw >= 2 * 128:
        # Keep the grid >= ~4 steps when the spatial extent allows it.
        target_tw = min(target_tw, max(128, (hw // 4) // 128 * 128))
    best = 128
    tw = 128
    while tw <= min(hw, target_tw):
        if hw % tw == 0:
            best = tw
        tw += 128
    return best


# ---------------------------------------------------------------------------
# Wrapper
# ---------------------------------------------------------------------------

def volume_norm_forward(x, running_mean, *, dims=(0, 1), training=True,
                        momentum=MOMENTUM, target_block_bytes=4 << 20):
    """Pallas VolumeNorm (CVN) forward.

    x:            (N, C, H, W) NCHW, matching the PyTorch module.
    running_mean: (1,1,1,1) initial buffer or (1,1,H,W) updated buffer.
    Returns (out, new_running_mean) in training, (out, running_mean) in eval.
    new_running_mean is the keepdim-mean-shaped (1,1,H,W) float32 buffer.
    """
    N, C, H, W = x.shape
    assert dims == (0, 1), "CVN dims=(0,1) supported; SVN would tile over C"
    nc = N * C
    hw = H * W
    dtype_bytes = jnp.dtype(x.dtype).itemsize

    # Free view: lane-dense 2D layout (NCHW is contiguous, reshape is a bitcast).
    x2 = x.reshape(nc, hw)

    tw = _pick_tw(hw, nc * dtype_bytes, target_block_bytes)
    grid = (hw // tw,)
    x_spec = pl.BlockSpec((nc, tw), lambda i: (0, i))
    m_spec = pl.BlockSpec((1, tw), lambda i: (0, i))

    rm_is_scalar = int(running_mean.size) == 1
    rm32 = running_mean.astype(jnp.float32)
    if rm_is_scalar:
        rm_in = rm32.reshape(1, 1)
        rm_spec = pl.BlockSpec(memory_space=pltpu.MemorySpace.SMEM)
        rm_bytes = 4
    else:
        assert running_mean.shape[-2:] == (H, W)
        rm_in = rm32.reshape(1, hw)
        rm_spec = m_spec
        rm_bytes = hw * 4

    out_mean_bytes = hw * 4 if training else 0
    cost = pl.CostEstimate(
        flops=2 * nc * hw,
        transcendentals=0,
        bytes_accessed=2 * nc * hw * dtype_bytes + rm_bytes + out_mean_bytes,
    )
    cparams = pltpu.CompilerParams(
        dimension_semantics=("parallel",),
        vmem_limit_bytes=48 << 20,   # fits under v7x's 64 MiB physical VMEM
    )

    if training:
        kernel = functools.partial(
            _vn_train_kernel_scalar if rm_is_scalar else _vn_train_kernel_full,
            momentum=momentum)
        out2, new_rm2 = pl.pallas_call(
            kernel,
            grid=grid,
            in_specs=[rm_spec, x_spec],
            out_specs=(x_spec, m_spec),
            out_shape=(
                jax.ShapeDtypeStruct((nc, hw), x.dtype),
                jax.ShapeDtypeStruct((1, hw), jnp.float32),
            ),
            compiler_params=cparams,
            cost_estimate=cost,
        )(rm_in, x2)
        return out2.reshape(N, C, H, W), new_rm2.reshape(1, 1, H, W)
    else:
        kernel = _vn_eval_kernel_scalar if rm_is_scalar else _vn_eval_kernel_full
        out2 = pl.pallas_call(
            kernel,
            grid=grid,
            in_specs=[rm_spec, x_spec],
            out_specs=x_spec,
            out_shape=jax.ShapeDtypeStruct((nc, hw), x.dtype),
            compiler_params=cparams,
            cost_estimate=cost,
        )(rm_in, x2)
        return out2.reshape(N, C, H, W), running_mean


# TODO(synk): the abstract InvertibleModule forward/inverse tuple + logdet
# plumbing (and CVN's logdet += 0) is pure host-side dispatch with no tensor
# math; it stays in Python.

if __name__ == "__main__":
    key = jax.random.PRNGKey(0)
    N, C, H, W = 2, 4, 16, 16
    x = jax.random.normal(key, (N, C, H, W), dtype=jnp.float32)

    # Mirrors register_buffer('running_mean', torch.zeros(1, 1, 1, 1)).
    running_mean = jnp.zeros((1, 1, 1, 1), dtype=jnp.float32)

    # Training-mode forward (scalar running-mean path, SMEM).
    out_train, new_rm = volume_norm_forward(
        x, running_mean, dims=(0, 1), training=True)
    jax.block_until_ready((out_train, new_rm))

    # Eval-mode forward with the updated buffer (full running-mean path, VMEM).
    out_eval, _ = volume_norm_forward(
        x, new_rm, dims=(0, 1), training=False)
    jax.block_until_ready(out_eval)

    # Eval-mode forward with the initial scalar buffer (SMEM scalar path).
    out_eval0, _ = volume_norm_forward(
        x, running_mean, dims=(0, 1), training=False)
    jax.block_until_ready(out_eval0)

    # Pure-JAX reference check.
    ref_mean = jnp.mean(x, axis=(0, 1), keepdims=True)
    ref_out_train = x - ref_mean
    ref_new_rm = (1.0 - MOMENTUM) * jnp.broadcast_to(
        running_mean, ref_mean.shape) + MOMENTUM * ref_mean
    ref_out_eval = x - ref_new_rm
    ref_out_eval0 = x - running_mean

    assert out_train.shape == x.shape and out_eval.shape == x.shape
    assert new_rm.shape == (1, 1, H, W)
    assert jnp.allclose(out_train, ref_out_train, atol=1e-5, rtol=1e-5)
    assert jnp.allclose(new_rm, ref_new_rm, atol=1e-5, rtol=1e-5)
    assert jnp.allclose(out_eval, ref_out_eval, atol=1e-5, rtol=1e-5)
    assert jnp.allclose(out_eval0, ref_out_eval0, atol=1e-5, rtol=1e-5)

    print("KERNEL_OK")
</pallas_src>

<mosaic_0001>
module attributes {stable_mosaic.version = 11 : i64} {
  func.func @_vn_train_kernel_scalar(%arg0: i32, %arg1: memref<1x1xf32, #tpu.memory_space<smem>>, %arg2: memref<8x128xf32, #tpu.memory_space<vmem>>, %arg3: memref<8x128xf32, #tpu.memory_space<vmem>>, %arg4: memref<1x128xf32, #tpu.memory_space<vmem>>) attributes {dimension_semantics = [#tpu.dimension_semantics<parallel>], iteration_bounds = array<i64: 2>, scalar_prefetch = 0 : i64, scratch_operands = 0 : i64, tpu.core_type = #tpu.core_type<tc>, window_params = [{transform_indices = @transform_0, window_bounds = array<i64: 1, 1>}, {transform_indices = @transform_1, window_bounds = array<i64: 8, 128>}, {transform_indices = @transform_2, window_bounds = array<i64: 8, 128>}, {transform_indices = @transform_3, window_bounds = array<i64: 1, 128>}]} {
    %c0 = arith.constant 0 : index
    %c0_0 = arith.constant 0 : index
    %0 = vector.load %arg2[%c0, %c0_0] : memref<8x128xf32, #tpu.memory_space<vmem>>, vector<8x128xf32>
    %cst = arith.constant dense<0.000000e+00> : vector<128xf32>
    %1 = vector.multi_reduction <add>, %0, %cst [0] : vector<8x128xf32> to vector<128xf32>
    %2 = vector.shape_cast %1 : vector<128xf32> to vector<1x128xf32>
    %cst_1 = arith.constant 8.000000e+00 : f32
    %3 = vector.broadcast %cst_1 : f32 to vector<1x128xf32>
    %4 = arith.divf %2, %3 : vector<1x128xf32>
    %5 = vector.broadcast %4 : vector<1x128xf32> to vector<8x128xf32>
    %6 = arith.subf %0, %5 : vector<8x128xf32>
    %c0_2 = arith.constant 0 : index
    %c0_3 = arith.constant 0 : index
    %7 = vector.load %arg3[%c0_2, %c0_3] : memref<8x128xf32, #tpu.memory_space<vmem>>, vector<8x128xf32>
    tpu.vector_store %arg3[%c0_2, %c0_3], %6 {strides = array<i32>} : memref<8x128xf32, #tpu.memory_space<vmem>>, vector<8x128xf32>,
    %c0_4 = arith.constant 0 : index
    %c0_5 = arith.constant 0 : index
    %8 = memref.load %arg1[%c0_4, %c0_5] : memref<1x1xf32, #tpu.memory_space<smem>>
    %cst_6 = arith.constant 0.899999976 : f32
    %9 = arith.mulf %cst_6, %8 : f32
    %cst_7 = arith.constant 1.000000e-01 : f32
    %10 = vector.broadcast %cst_7 : f32 to vector<1x128xf32>
    %11 = arith.mulf %10, %4 : vector<1x128xf32>
    %12 = vector.broadcast %9 : f32 to vector<1x128xf32>
    %13 = arith.addf %12, %11 : vector<1x128xf32>
    %c0_8 = arith.constant 0 : index
    %c0_9 = arith.constant 0 : index
    %14 = vector.load %arg4[%c0_8, %c0_9] : memref<1x128xf32, #tpu.memory_space<vmem>>, vector<1x128xf32>
    tpu.vector_store %arg4[%c0_8, %c0_9], %13 {strides = array<i32>} : memref<1x128xf32, #tpu.memory_space<vmem>>, vector<1x128xf32>,
    return
  }
  func.func @transform_0(%arg0: i32) -> (i32, i32) {
    %c0_i32 = arith.constant 0 : i32
    %c0_i32_0 = arith.constant 0 : i32
    %c0_i32_1 = arith.constant 0 : i32
    return %c0_i32, %c0_i32_0 : i32, i32
  }
  func.func @transform_1(%arg0: i32) -> (i32, i32) {
    %c0_i32 = arith.constant 0 : i32
    %c0_i32_0 = arith.constant 0 : i32
    return %c0_i32, %arg0 : i32, i32
  }
  func.func @transform_2(%arg0: i32) -> (i32, i32) {
    %c0_i32 = arith.constant 0 : i32
    %c0_i32_0 = arith.constant 0 : i32
    return %c0_i32, %arg0 : i32, i32
  }
  func.func @transform_3(%arg0: i32) -> (i32, i32) {
    %c0_i32 = arith.constant 0 : i32
    %c0_i32_0 = arith.constant 0 : i32
    return %c0_i32, %arg0 : i32, i32
  }
}

</mosaic_0001>

<bundles_post_ra>
// kernel: tpu_custom_call.1
= control target key start
LH: loop header
LB: loop body
LE: loop exit
PB: predicated region body
PF: predicated region fallthrough
CT: control target
= control target key end

     0   :  { %s728_s0 = inlined_call_operand.<no memory space> [shape: f32[1,1], index: 0, kind: input, shape index: {}]   ;;  %s729_s1 = inlined_call_operand.hbm [shape: f32[8,256], index: 1, kind: input, shape index: {}]   ;;  %s730_s2 = inlined_call_operand.hbm [shape: f32[8,256], index: 2, kind: output, shape index: {0}]   ;;  %s731_s3 = inlined_call_operand.hbm [shape: f32[1,256], index: 3, kind: output, shape index: {1}]  }
   0x1   :  { %9 = sst [smem:[#allocation2]] %s728_s0 }
   0x2   :  { %10 = vsyncpa [#allocation4], 0 }
   0x3   :  { %12 = vsyncpa [#allocation4 + $0x1], 0 }
   0x4   :  { %13 = vsyncpa [#allocation5], 0 }
   0x5   :  { %15 = vsyncpa [#allocation5 + $0x1], 0 }
   0x6   :  { %16 = vsyncpa [#allocation8], 0 }
   0x7   :  { %18 = vsyncpa [#allocation8 + $0x1], 0  ;;  %s573_s14 = smov 0   ;;  %s575_s15 = smov 0  }
   0x8   :  { %s577_s16 = smov 0   ;;  %s579_s17 = smov 0  }
   0x9 LB: > { %s594_s0 = sadd.s32 4294967295, %s547_s17   ;;  %s353_s18 = sadd.s32 4294967294, %s547_s17   ;;  %s547_s17 = sphi %s579_s17, %s741_s17   ;;  %s543_s16 = sphi %s577_s16, %s740_s16   ;;  %s539_s15 = sphi %s575_s15, %s739_s15   ;;  %s535_s14 = sphi %s573_s14, %s738_s14  }
   0xa   : > { %s598_s19 = sadd.s32 1, %s547_s17   ;;  %s52_s20 = sadd.s32 1, %s543_s16 }
   0xb   : > { %s49_s21 = ssub.s32 %s547_s17, %s598_s19  ;;  %p59_p0 = scmp.ne.s32.totalorder %s543_s16, %s539_s15 }
   0xc   : > { %p50_p1 = scmp.eq.s32.totalorder %s49_s21, 0  ;;  %p60_p2 = scmp.eq.s32.totalorder %s547_s17, 0 }
   0xd   : > { %p65_p3 = scmp.ne.s32.totalorder %s539_s15, %s535_s14  ;;  %p66_p4 = scmp.eq.s32.totalorder %s594_s0, 0 }
   0xe   : > { %s610_s22 = scalar_select %p50_p1, %s543_s16, %s52_s20  }
   0xf   : > { %p612_p5 = por %p60_p2, %p59_p0  ;;  %p616_p6 = por %p66_p4, %p65_p3 }
  0x10   : > { %p89_p7 = scmp.eq.s32.totalorder %s594_s0, 1  ;;  %p95_p8 = scmp.eq.s32.totalorder %s353_s18, 1 }
  0x11   : > { %p382_p10 = scmp.lt.s32.totalorder %s547_s17, 2  ;;  %s144_s27 = sand.u32 1, %s543_s16  }
  0x12   : > { %p623_p11 = por %p89_p7, %p59_p0  ;;  %p627_p12 = por %p95_p8, %p65_p3 }
  0x13   : > { %s357_s28 = sshll.u32 %s547_s17, 3  ;;  %s356_s29 = sshll.u32 %s144_s27, 3 }
  0x14   : > { %s152_s5 = scalar_lea.hbm %s729_s1, %s357_s28  ;;  %s148_s7 = scalar_lea.vmem [#allocation3], %s356_s29 }
  0x15   : > { %s154_s6 = sshll.u32 %s152_s5, 4  ;;  %s156_s8 = sshll.u32 %s148_s7, 4  ;;  %s155_s6 = int_to_ptr.hbm [resolvable:$true] %s154_s6  ;;  %s157_s8 = int_to_ptr.vmem [resolvable:$true] %s156_s8 }
  0x16   : > { %p638_p13 = pnand %p382_p10, %p612_p5  ;;  %p358_p0 = scmp.ge.s32.totalorder %s547_s17, 1 }
  0x17   : > { %p161_p1 = scmp.lt.s32.totalorder %s547_s17, 3  ;;  %s145_s10 = scalar_lea.sflag [#allocation4], %s144_s27 }
  0x18   : > { %s419_s11 = sshra.s32 %s155_s6, 4  ;;  %p423_p3 = pneg %p638_p13  ;;  %s420_s11 = int_to_ptr.hbm [resolvable:$true] %s419_s11 }
  0x19   : > { %s421_s12 = scalar_lea.hbm %s420_s11, 8  ;;  %s426_s20 = scalar_lea.hbm %s729_s1, 16 }
  0x1a   : > { %p422_p2 = scmp.ne.s32.totalorder %s420_s11, %s421_s12  ;;  %p427_p5 = scmp.lt.s32.totalorder %s420_s11, %s729_s1 }
  0x1b   : > { %p428_p8 = scmp.lt.s32.totalorder %s426_s20, %s421_s12 }
  0x1c   : > { %p424_p4 = pnand %p423_p3, %p422_p2 }
  0x1d   : > { %p429_p10 = por %p428_p8, %p427_p5 }
  0x1e   : > { %p425_p7 = pneg %p424_p4 }
  0x20   : > { %p430_p9 = pnand %p429_p10, %p425_p7 }
  0x22   : > { %433 = shalt.err (!%p430_p9)
}
  0x23   : > { %374 = dma.hbm_to_vmem [thread:$0]  (!%p638_p13), %s155_s6, 128, %s157_s8, %s145_s10  }
  0x24   : > { %p162_p2 = pnand %p358_p0, %p161_p1 }
  0x25   : > { %s659_s27 = sand.u32 (!%p162_p2), 1, %s539_s15  }
  0x26   : > { %165 = sbr.rel (%p162_p2) target bundleno = 80 (0x50), region = 28  ;;  %s359_s28 = sshll.u32 (!%p162_p2), %s659_s27, 3 }
  0x27   : > { %s168_s29 = scalar_lea.sflag (!%p162_p2), [#allocation4], %s659_s27  ;;  %s171_s30 = scalar_lea.vmem (!%p162_p2), [#allocation3], %s359_s28 }
  0x2b   : > { %522 = dma.done.wait (%p616_p6), %s168_s29, 128  }
  0x2c   : > { %524 = vsyncadd (%p616_p6), %s168_s29, 4294967168  ;;  %v549_v0 = vmov 8.0   ;;  %v199_v2 = vld [vmem:[%s171_s30] sm:$0xff]  ;;  %s216_s4 = sld [smem:[#allocation2]]  ;;  %s362_s5 = sshll.u32 %s594_s0, 3 }
  0x2d   : > { %417 = vrcp.f32 %v549_v0  ;;  %v200_v3 = vrot.slane %v199_v2, 4  ;;  %s237_s7 = scalar_lea.hbm %s730_s2, %s362_s5  ;;  %s192_s9 = scalar_lea.vmem [#allocation6], %s359_s28 }
  0x2e   : > { %s239_s10 = sshll.u32 %s192_s9, 4  ;;  %s250_s13 = scalar_lea.hbm %s731_s3, %s594_s0  ;;  %s240_s10 = int_to_ptr.vmem [resolvable:$true] %s239_s10 }
  0x2f   : > { %v201_v5 = vadd.f32 %v200_v3, %v199_v2  ;;  %s241_s18 = sshll.u32 %s237_s7, 4  ;;  %s198_s20 = scalar_lea.vmem [#allocation7], %s659_s27  ;;  %s242_s18 = int_to_ptr.hbm [resolvable:$true] %s241_s18 }
  0x30   : > { %s676_s21 = sshll.u32 %s198_s20, 4  ;;  %s678_s23 = sshll.u32 %s250_s13, 4  ;;  %s253_s21 = int_to_ptr.vmem [resolvable:$true] %s676_s21  ;;  %s255_s23 = int_to_ptr.hbm [resolvable:$true] %s678_s23 }
  0x31   : > { %v202_v7 = vrot.slane %v201_v5, 2  ;;  %s223_s0 = scalar_lea.sflag [#allocation5], %s659_s27  ;;  %s463_s28 = sshra.s32 %s242_s18, 4  ;;  %s464_s28 = int_to_ptr.hbm [resolvable:$true] %s463_s28 }
  0x32   : > { %s217_s8 = smul.f32 0.9, %s216_s4  ;;  %s465_s29 = scalar_lea.hbm %s464_s28, 8 }
  0x33   : > { %v418_v1 = vpop.eup %417  ;;  %v203_v9 = vadd.f32 %v202_v7, %v201_v5  ;;  %p466_p6 = scmp.ne.s32.totalorder %s464_s28, %s465_s29  ;;  %s469_s5 = scalar_lea.hbm %s730_s2, 16 }
  0x34   : > { %v207_v4 = vmul.f32 8.0, %v418_v1  ;;  %vm211_vm0 = vweird.f32 %v418_v1  ;;  %v219_v15 = vstv %s217_s8  ;;  %p470_p0 = scmp.lt.s32.totalorder %s464_s28, %s730_s2  ;;  %p471_p1 = scmp.lt.s32.totalorder %s469_s5, %s465_s29 }
  0x35   : > { %v204_v11 = vrot.slane %v203_v9, 1  ;;  %p467_p9 = pnand %p466_p6, %p623_p11 }
  0x36   : > { %v208_v6 = vsub.f32 1.0, %v207_v4  ;;  %p472_p3 = por %p471_p1, %p470_p0 }
  0x37   : > { %v205_v13 = vadd.f32 %v204_v11, %v203_v9  ;;  %p468_p13 = pneg %p467_p9 }
  0x38   : > { %v209_v8 = vmul.f32 %v418_v1, %v208_v6 }
  0x39   : > { %p473_p4 = pnand %p472_p3, %p468_p13 }
  0x3a   : > { %v210_v10 = vadd.f32 %v418_v1, %v209_v8 }
  0x3c   : > { %v212_v12 = vsel %vm211_vm0, %v418_v1, %v210_v10 }
  0x3d   : > { %v213_v14 = vmul.f32 %v212_v12, %v205_v13 }
  0x3f   : > { %v214_v16 = vsub.f32 %v199_v2, %v213_v14  ;;  %v218_v17 = vmul.f32 0.1, %v213_v14 }
  0x41   : > { %215 = vst [vmem:[%s192_s9] sm:$0xff] %v214_v16  ;;  %v220_v18 = vadd.f32 %v219_v15, %v218_v17 }
  0x42   : > { %476 = shalt.err (!%p473_p4)
}
  0x43   : > { %367 = dma.vmem_to_hbm [thread:$0]  (%p623_p11), %s240_s10, 128, %s242_s18, %s223_s0   ;;  %221 = vst [vmem:[%s198_s20] sm:$0x1] %v220_v18 }
  0x44   : > { %s228_s7 = scalar_lea.sflag [#allocation8], %s659_s27  ;;  %s491_s8 = sshra.s32 %s255_s23, 4  ;;  %s492_s8 = int_to_ptr.hbm [resolvable:$true] %s491_s8 }
  0x45   : > { %s493_s9 = scalar_lea.hbm %s492_s8, 1  ;;  %s497_s13 = scalar_lea.hbm %s731_s3, 2 }
  0x46   : > { %p494_p7 = scmp.ne.s32.totalorder %s492_s8, %s493_s9  ;;  %p498_p10 = scmp.lt.s32.totalorder %s492_s8, %s731_s3 }
  0x47   : > { %p499_p2 = scmp.lt.s32.totalorder %s497_s13, %s493_s9 }
  0x48   : > { %p495_p5 = pnand %p494_p7, %p623_p11 }
  0x49   : > { %p500_p6 = por %p499_p2, %p498_p10 }
  0x4a   : > { %p496_p8 = pneg %p495_p5 }
  0x4c   : > { %p501_p9 = pnand %p500_p6, %p496_p8 }
  0x4e   : > { %504 = shalt.err (!%p501_p9)
}
  0x4f   : > { %368 = dma.vmem_to_hbm [thread:$0]  (%p623_p11), %s253_s21, 16, %s255_s23, %s228_s7  }
  0x50 PF: > { %s266_s27 = sand.u32 1, %s535_s14   ;;  %p737_p13 = scmp.ge.s32.totalorder %s547_s17, 2 }
  0x51   : > { %s267_s10 = scalar_lea.sflag [#allocation5], %s266_s27 }
  0x52   : > { %p376_p0 = pnand %p737_p13, %p627_p12 }
  0x54   : > { %p377_p1 = pneg %p376_p0 }
  0x56   : > { %526 = dma.done.wait (%p377_p1), %s267_s10, 128  }
  0x57   : > { %528 = vsyncadd (%p377_p1), %s267_s10, 4294967168  ;;  %s277_s18 = scalar_lea.sflag [#allocation8], %s266_s27 }
  0x58   : > { %530 = dma.done.wait (%p377_p1), %s277_s18, 16  }
  0x59   : > { %532 = vsyncadd (%p377_p1), %s277_s18, 4294967280  ;;  %p21_p11 = scmp.ge.s32.totalorder %s598_s19, 4   ;;  %s738_s14 = smov %s539_s15 }
  0x5a   : > { %s739_s15 = smov %s543_s16  ;;  %s740_s16 = smov %s610_s22 }
  0x5b   : > { %s741_s17 = smov %s598_s19  ;;  %23 = sbr.rel (!%p21_p11) target bundleno = 9 (0x9), region = 90 }
  0x60   :  { %282 = vsyncpa [#allocation4], 1 }
  0x61   :  { %284 = vsyncpa [#allocation4 + $0x1], 1 }
  0x62   :  { %285 = vsyncpa [#allocation5], 1 }
  0x63   :  { %287 = vsyncpa [#allocation5 + $0x1], 1 }
  0x64   :  { %288 = vsyncpa [#allocation8], 1 }
  0x65   :  { %290 = vsyncpa [#allocation8 + $0x1], 1 }

</bundles_post_ra>
